<compile_context>
chip_gen: v7x
topology: tpu7x:2x2x1
jax: 0.10.0
libtpu: 0.0.40
codegen_flags: <defaults>
</compile_context>

<pallas_src>
import math

import jax
import jax.numpy as jnp
from jax.experimental import pallas as pl
from jax.experimental.pallas import tpu as pltpu


_LANE = 128
_MIN_ROW_TILES = 8          # aim for >= this many grid steps (pipelining, dual-TC on v7x)
_LANE_FOLD_TARGET = 512     # fold rows into lanes until the output block is >= this wide
_LANE_FOLD_MAX = 2048       # no benefit folding wider than this
_MIN_DMA_RUN_BYTES = 512    # min per-row run for the strided HBM->HBM DMA fast path


def _round_up(a, b):
    return ((a + b - 1) // b) * b


def _vmem_budgets():
    """Generation-aware (tile_budget_bytes, vmem_limit_bytes)."""
    try:
        cap = int(pltpu.get_tpu_info().vmem_capacity_bytes)
    except Exception:
        cap = 64 * 1024 * 1024
    if cap >= 96 * 1024 * 1024:                    # v5e / v6e: 128 MiB VMEM per core
        return 48 * 1024 * 1024, 96 * 1024 * 1024
    return 24 * 1024 * 1024, 40 * 1024 * 1024      # v7x: 64 MiB per TensorCore


def _copy_cost(nbytes):
    # Pure data movement: read everything once, write everything once.
    return pl.CostEstimate(flops=0, transcendentals=0, bytes_accessed=2 * nbytes)


# ----------------------------------------------------------------------------
# Fast path: pure HBM->HBM DMA concat (zero compute, zero VMEM staging).
# ----------------------------------------------------------------------------
def _dma_concat_cols_kernel(x_hbm, y_hbm, o_hbm, sem):
    sx = x_hbm.shape[1]
    cx = pltpu.make_async_copy(x_hbm, o_hbm.at[:, :sx], sem.at[0])
    cy = pltpu.make_async_copy(y_hbm, o_hbm.at[:, sx:], sem.at[1])
    cx.start()
    cy.start()
    cx.wait()
    cy.wait()


def _concat_cols_dma(x2, y2):
    rows, sx = x2.shape
    sy = y2.shape[1]
    nbytes = (x2.size + y2.size) * jnp.dtype(x2.dtype).itemsize
    return pl.pallas_call(
        _dma_concat_cols_kernel,
        out_shape=jax.ShapeDtypeStruct((rows, sx + sy), x2.dtype),
        in_specs=[pl.BlockSpec(memory_space=pl.ANY),
                  pl.BlockSpec(memory_space=pl.ANY)],
        out_specs=pl.BlockSpec(memory_space=pl.ANY),
        scratch_shapes=[pltpu.SemaphoreType.DMA((2,))],
        cost_estimate=_copy_cost(nbytes),
        compiler_params=pltpu.CompilerParams(has_side_effects=True),
    )(x2, y2)


# ----------------------------------------------------------------------------
# Fallback: row-tiled VMEM copy with a single lane-dense output store.
# ----------------------------------------------------------------------------
def _make_concat_kernel(g, sxp, syp):
    """Kernel for (possibly lane-folded) blocks.

    x block: (tr, g*sxp), y block: (tr, g*syp), out block: (tr, g*(sxp+syp)).
    The output row is the interleave [x_0, y_0, x_1, y_1, ...]; it is assembled
    in vregs and written with ONE full-width (unmasked) store per block.
    """
    def kernel(x_ref, y_ref, o_ref):
        x = x_ref[...]
        y = y_ref[...]
        parts = []
        for i in range(g):
            parts.append(x[:, i * sxp:(i + 1) * sxp])
            parts.append(y[:, i * syp:(i + 1) * syp])
        o_ref[...] = jnp.concatenate(parts, axis=-1)
    return kernel


def _concat_cols_vmem(x2, y2):
    rows, sx = x2.shape
    sy = y2.shape[1]
    out_cols = sx + sy
    dtype = x2.dtype
    itemsize = jnp.dtype(dtype).itemsize
    nbytes = (x2.size + y2.size) * itemsize
    sub = 8 * max(1, 4 // itemsize)              # sublane tile: 8 (f32), 16 (bf16), 32 (i8)

    # --- Lane folding: make narrow outputs lane-dense (free reshape in HBM). ---
    g = 1
    if out_cols < _LANE_FOLD_TARGET and rows >= 2 * sub:
        for cand in range(2, min(rows // sub, 32) + 1):
            if rows % cand:
                continue
            if cand * out_cols > _LANE_FOLD_MAX:
                break
            g = cand
            if cand * out_cols >= _LANE_FOLD_TARGET:
                break
    if g > 1:
        x3 = x2.reshape(rows // g, g * sx)
        y3 = y2.reshape(rows // g, g * sy)
    else:
        x3, y3 = x2, y2
    R = rows // g
    Cx, Cy = g * sx, g * sy
    C = Cx + Cy

    budget, vmem_limit = _vmem_budgets()
    bytes_per_row = 2 * (2 * C) * itemsize       # (x + y) + out, double buffered

    # --- Row-tile selection: fit the budget, but never collapse to a 1-step
    #     grid when there are enough rows to split (pipelining + v7x dual-TC). ---
    if R <= sub:
        tr = R
    else:
        tr_budget = max(sub, (budget // bytes_per_row) // sub * sub)
        tr_split = _round_up(pl.cdiv(R, _MIN_ROW_TILES), sub)
        tr = max(sub, min(tr_budget, tr_split))

    if tr * bytes_per_row > vmem_limit:
        # TODO(synk): rows-tiny / cols-huge / lane-misaligned shapes would need a
        # column-chunked manual-DMA path; defer to XLA's concatenate for them.
        return jnp.concatenate((x2, y2), axis=-1)

    grid = (pl.cdiv(R, tr),)
    out3 = pl.pallas_call(
        _make_concat_kernel(g, sx, sy),
        out_shape=jax.ShapeDtypeStruct((R, C), dtype),
        grid=grid,
        in_specs=[pl.BlockSpec((tr, Cx), lambda i: (i, 0)),
                  pl.BlockSpec((tr, Cy), lambda i: (i, 0))],
        out_specs=pl.BlockSpec((tr, C), lambda i: (i, 0)),
        cost_estimate=_copy_cost(nbytes),
        compiler_params=pltpu.CompilerParams(
            dimension_semantics=("parallel",),
            vmem_limit_bytes=vmem_limit),
    )(x3, y3)
    # (R, C) is a row-major view of (rows, out_cols); the caller reshapes.
    return out3


# ----------------------------------------------------------------------------
# Public wrapper: torch.cat((x, y), dim=dim)
# ----------------------------------------------------------------------------
def concatenation(x, y, *, dim):
    """Pallas TPU equivalent of torch.cat((x, y), dim=dim)."""
    if x.ndim != y.ndim:
        raise ValueError("rank mismatch")
    if x.dtype != y.dtype:
        raise ValueError("dtype mismatch")
    if x.ndim == 0:
        raise ValueError("torch.cat requires at least 1-D inputs")
    d = dim % x.ndim
    for ax in range(x.ndim):
        if ax != d and x.shape[ax] != y.shape[ax]:
            raise ValueError("non-concat dims must match")

    out_shape = list(x.shape)
    out_shape[d] = x.shape[d] + y.shape[d]
    out_shape = tuple(out_shape)

    # torch.cat edge cases: empty operands / empty output.
    if x.shape[d] == 0:
        return y
    if y.shape[d] == 0:
        return x
    if math.prod(out_shape) == 0:
        return jnp.zeros(out_shape, dtype=x.dtype)

    # Flatten to 2-D: rows = prod(dims before d); cols = dim d * trailing dims.
    lead = math.prod(x.shape[:d])
    x2 = x.reshape(lead, -1)
    y2 = y.reshape(lead, -1)
    sx, sy = x2.shape[1], y2.shape[1]
    itemsize = jnp.dtype(x.dtype).itemsize

    # Static dispatch (no runtime try/except).  The HBM->HBM DMA path needs a
    # 128-lane-aligned boundary on both sides, and long enough per-row runs so
    # the strided destination writes don't waste HBM BW (worst on v7x @3.2TB/s).
    aligned = (sx % _LANE == 0) and (sy % _LANE == 0)
    long_runs = (lead == 1) or (min(sx, sy) * itemsize >= _MIN_DMA_RUN_BYTES)
    if aligned and long_runs:
        out2 = _concat_cols_dma(x2, y2)
    else:
        # Misaligned (or short-run) boundary: lane-folded, row-tiled VMEM copy.
        out2 = _concat_cols_vmem(x2, y2)

    return out2.reshape(out_shape)


if __name__ == "__main__":
    key = jax.random.PRNGKey(0)
    kx, ky = jax.random.split(key)

    # Small NCHW-style inputs.
    x = jax.random.normal(kx, (2, 4, 16, 16), dtype=jnp.float32)
    y = jax.random.normal(ky, (2, 4, 16, 16), dtype=jnp.float32)

    # Channel concat (dim=1) -- aligned boundary, long runs -> HBM->HBM DMA path.
    out_c = concatenation(x, y, dim=1)
    jax.block_until_ready(out_c)
    assert out_c.shape == (2, 8, 16, 16)
    assert bool(jnp.array_equal(out_c, jnp.concatenate((x, y), axis=1)))

    # Last-axis concat (dim=-1) -- misaligned boundary -> lane-folded VMEM path.
    out_l = concatenation(x, y, dim=-1)
    jax.block_until_ready(out_l)
    assert out_l.shape == (2, 4, 16, 32)
    assert bool(jnp.array_equal(out_l, jnp.concatenate((x, y), axis=-1)))

    # Leading-axis concat (dim=0) -- rows==1, contiguous whole-array DMA path.
    out_0 = concatenation(x, y, dim=0)
    jax.block_until_ready(out_0)
    assert out_0.shape == (4, 4, 16, 16)
    assert bool(jnp.array_equal(out_0, jnp.concatenate((x, y), axis=0)))

    print("KERNEL_OK")
</pallas_src>

<mosaic_0001>
module attributes {stable_mosaic.version = 11 : i64} {
  func.func @_dma_concat_cols_kernel(%arg0: memref<2x1024xf32, #tpu.memory_space<any>>, %arg1: memref<2x1024xf32, #tpu.memory_space<any>>, %arg2: memref<2x2048xf32, #tpu.memory_space<any>>, %arg3: memref<2x!tpu.dma_semaphore, #tpu.memory_space<semaphore_mem>>) attributes {dimension_semantics = [], scalar_prefetch = 0 : i64, scratch_operands = 1 : i64, tpu.core_type = #tpu.core_type<tc>} {
    %c0_i32 = arith.constant 0 : i32
    %c0_i32_0 = arith.constant 0 : i32
    %c0_i32_1 = arith.constant 0 : i32
    %0 = tpu.memref_slice %arg2[%c0_i32_0, %c0_i32_1] : memref<2x2048xf32, #tpu.memory_space<any>> -> memref<2x1024xf32, #tpu.memory_space<any>>
    %1 = tpu.memref_slice %arg3[%c0_i32] : memref<2x!tpu.dma_semaphore, #tpu.memory_space<semaphore_mem>> -> memref<1x!tpu.dma_semaphore, #tpu.memory_space<semaphore_mem>>
    %2 = tpu.memref_squeeze %1 : memref<1x!tpu.dma_semaphore, #tpu.memory_space<semaphore_mem>> -> memref<!tpu.dma_semaphore, #tpu.memory_space<semaphore_mem>>
    tpu.enqueue_dma source(%arg0 : memref<2x1024xf32, #tpu.memory_space<any>>) target(%0 : memref<2x1024xf32, #tpu.memory_space<any>>) target_semaphore(%2 : memref<!tpu.dma_semaphore, #tpu.memory_space<semaphore_mem>>)
    %c1_i32 = arith.constant 1 : i32
    %c0_i32_2 = arith.constant 0 : i32
    %c1024_i32 = arith.constant 1024 : i32
    %3 = tpu.memref_slice %arg2[%c0_i32_2, %c1024_i32] : memref<2x2048xf32, #tpu.memory_space<any>> -> memref<2x1024xf32, #tpu.memory_space<any>>
    %4 = tpu.memref_slice %arg3[%c1_i32] : memref<2x!tpu.dma_semaphore, #tpu.memory_space<semaphore_mem>> -> memref<1x!tpu.dma_semaphore, #tpu.memory_space<semaphore_mem>>
    %5 = tpu.memref_squeeze %4 : memref<1x!tpu.dma_semaphore, #tpu.memory_space<semaphore_mem>> -> memref<!tpu.dma_semaphore, #tpu.memory_space<semaphore_mem>>
    tpu.enqueue_dma source(%arg1 : memref<2x1024xf32, #tpu.memory_space<any>>) target(%3 : memref<2x1024xf32, #tpu.memory_space<any>>) target_semaphore(%5 : memref<!tpu.dma_semaphore, #tpu.memory_space<semaphore_mem>>)
    %c0_i32_3 = arith.constant 0 : i32
    %c0_i32_4 = arith.constant 0 : i32
    %c0_i32_5 = arith.constant 0 : i32
    %6 = tpu.memref_slice %arg2[%c0_i32_4, %c0_i32_5] : memref<2x2048xf32, #tpu.memory_space<any>> -> memref<2x1024xf32, #tpu.memory_space<any>>
    %7 = tpu.memref_slice %arg3[%c0_i32_3] : memref<2x!tpu.dma_semaphore, #tpu.memory_space<semaphore_mem>> -> memref<1x!tpu.dma_semaphore, #tpu.memory_space<semaphore_mem>>
    %8 = tpu.memref_squeeze %7 : memref<1x!tpu.dma_semaphore, #tpu.memory_space<semaphore_mem>> -> memref<!tpu.dma_semaphore, #tpu.memory_space<semaphore_mem>>
    tpu.wait_dma2 semaphore(%8 : memref<!tpu.dma_semaphore, #tpu.memory_space<semaphore_mem>>) src(%arg0 : memref<2x1024xf32, #tpu.memory_space<any>>) dst(%6 : memref<2x1024xf32, #tpu.memory_space<any>>)
    %c1_i32_6 = arith.constant 1 : i32
    %c0_i32_7 = arith.constant 0 : i32
    %c1024_i32_8 = arith.constant 1024 : i32
    %9 = tpu.memref_slice %arg2[%c0_i32_7, %c1024_i32_8] : memref<2x2048xf32, #tpu.memory_space<any>> -> memref<2x1024xf32, #tpu.memory_space<any>>
    %10 = tpu.memref_slice %arg3[%c1_i32_6] : memref<2x!tpu.dma_semaphore, #tpu.memory_space<semaphore_mem>> -> memref<1x!tpu.dma_semaphore, #tpu.memory_space<semaphore_mem>>
    %11 = tpu.memref_squeeze %10 : memref<1x!tpu.dma_semaphore, #tpu.memory_space<semaphore_mem>> -> memref<!tpu.dma_semaphore, #tpu.memory_space<semaphore_mem>>
    tpu.wait_dma2 semaphore(%11 : memref<!tpu.dma_semaphore, #tpu.memory_space<semaphore_mem>>) src(%arg1 : memref<2x1024xf32, #tpu.memory_space<any>>) dst(%9 : memref<2x1024xf32, #tpu.memory_space<any>>)
    return
  }
}

</mosaic_0001>

<bundles_post_ra>
// kernel: tpu_custom_call.1
= control target key start
LH: loop header
LB: loop body
LE: loop exit
PB: predicated region body
PF: predicated region fallthrough
CT: control target
= control target key end

     0   :  { %s65_s12 = smov [#allocation2]   ;;  %s66_s13 = smov [#allocation3]   ;;  %s97_s0 = inlined_call_operand.hbm [shape: f32[2,1024], index: 0, kind: input, shape index: {}]   ;;  %s98_s2 = inlined_call_operand.hbm [shape: f32[2,2048], index: 2, kind: output, shape index: {}]   ;;  %s99_s1 = inlined_call_operand.hbm [shape: f32[2,1024], index: 1, kind: input, shape index: {}]  }
   0x1   :  { %s20_s11 = scalar_lea.hbm %s98_s2, 256  ;;  %s67_s14 = smov 0  }
   0x2   :  { %19 = dma.general %s97_s0, 256, %s98_s2, %s65_s12, %s66_s13, [#allocation4], %s67_s14, 0  }
   0x3   :  { %s68_s19 = smov [#allocation2 + $0x1]   ;;  %s69_s20 = smov [#allocation5]  }
   0x4   :  { %34 = dma.general %s99_s1, 256, %s20_s11, %s68_s19, %s69_s20, [#allocation6], %s67_s14, 0  }
   0x5   :  { %61 = dma.done.wait [#allocation2], 256 }
   0x6   :  { %62 = vsyncadd [#allocation2], 4294967040 }
   0x7   :  { %63 = dma.done.wait [#allocation2 + $0x1], 256 }
   0x8   :  { %64 = vsyncadd [#allocation2 + $0x1], 4294967040 }
   0x9   :  { %41 = vsyncmov [#allocation2] }
   0xc   :  { %s42_s23 = vpop.sfrf %41 }
   0xd   :  { %p54_p0 = scmp.ne.s32.totalorder %s42_s23, 0 }
   0xf   :  { %46 = shalt.err (%p54_p0)  }
  0x10   :  { %48 = vsyncmov [#allocation2 + $0x1] }
  0x13   :  { %s49_s24 = vpop.sfrf %48 }
  0x14   :  { %p55_p1 = scmp.ne.s32.totalorder %s49_s24, 0 }
  0x16   :  { %53 = shalt.err (%p55_p1)  }

</bundles_post_ra>
